<compile_context>
chip_gen: v7x
topology: tpu7x:2x2x1
jax: 0.10.0
libtpu: 0.0.40
codegen_flags: <defaults>
</compile_context>

<pallas_src>
import functools

import jax
import jax.numpy as jnp
from jax import lax
from jax.experimental import pallas as pl
from jax.experimental.pallas import tpu as pltpu

EPS = 1e-5           # torch.nn.BatchNorm1d default eps
_N_STAGES = 4        # the module has exactly 4 FlattenConsecutive/Linear/BN/Tanh blocks
_LANE = 128
_VMEM = pl.BlockSpec(memory_space=pltpu.MemorySpace.VMEM)


def _digit_reverse_perm(T, d):
    """perm[p] = base-d digit reversal of p over _N_STAGES digits (requires T == d**4).

    Ordering token rows as  row = perm_position * B + batch  makes every
    FlattenConsecutive(d) a combination of d *contiguous*, sublane-aligned row chunks
    (chunk c holds original time positions == c (mod d)), so the fused kernel never
    reshapes or strided-gathers activation rows.
    """
    perm = []
    for p in range(T):
        q, t = p, 0
        for _ in range(_N_STAGES):
            t = t * d + q % d
            q //= d
        perm.append(t)
    return perm


def _use_fused_k():
    """True on 256-deep-MXU chips (v6e/v7x): fuse the d split dots into one K=d*H dot."""
    try:
        kind = jax.devices()[0].device_kind.lower()
    except Exception:
        return True
    return not any(v in kind for v in ("v2", "v3", "v4", "v5"))


# ------------------------------ fused kernel --------------------------------

def _wavenet_kernel(pre1_ref, g1_ref, b1_ref,
                    w2_ref, g2_ref, b2_ref,
                    w3_ref, g3_ref, b3_ref,
                    w4_ref, g4_ref, b4_ref,
                    w5_ref, b5_ref,
                    out_ref, *, d, fuse_k):
    def bn_tanh(acc, g_ref, b_ref):
        # BatchNorm1d training-mode batch stats (biased variance), centered two-pass
        # formulation, affine folded into a single per-channel scale/shift, then Tanh.
        inv_n = 1.0 / acc.shape[0]
        mean = jnp.sum(acc, axis=0, keepdims=True) * inv_n
        cent = acc - mean
        var = jnp.sum(cent * cent, axis=0, keepdims=True) * inv_n
        scale = g_ref[...] * lax.rsqrt(var + EPS)
        return jnp.tanh(cent * scale + b_ref[...])

    def flatten_linear(h, w_ref):
        # FlattenConsecutive(d) + Linear(H*d, H, bias=False) over d contiguous,
        # sublane-aligned row chunks of h.
        rows = h.shape[0] // d
        hidden = h.shape[1]
        chunks = [h[c * rows:(c + 1) * rows, :] for c in range(d)]
        if fuse_k:
            # v6e/v7x: lane-concat (pure vreg placement, both operands 128-aligned)
            # and one K = d*H matmul; accumulation happens inside the MXU.
            h_cat = jnp.concatenate(chunks, axis=1)
            return jnp.dot(h_cat, w_ref[...], preferred_element_type=jnp.float32)
        # v5e and older: 128-deep MXU, keep split dots + VALU add.
        acc = jnp.dot(chunks[0], w_ref[0:hidden, :],
                      preferred_element_type=jnp.float32)
        for c in range(1, d):
            acc = acc + jnp.dot(chunks[c], w_ref[c * hidden:(c + 1) * hidden, :],
                                preferred_element_type=jnp.float32)
        return acc

    # Stage 1: pre-activation (embedding gather + Linear1) was folded in the wrapper.
    h = bn_tanh(pre1_ref[...], g1_ref, b1_ref)               # (B*T/d,   H)
    h = bn_tanh(flatten_linear(h, w2_ref), g2_ref, b2_ref)   # (B*T/d^2, H)
    h = bn_tanh(flatten_linear(h, w3_ref), g3_ref, b3_ref)   # (B*T/d^3, H)
    h = bn_tanh(flatten_linear(h, w4_ref), g4_ref, b4_ref)   # (B,       H) batch order

    # Final nn.Linear(n_hidden, n_classes) with bias, padded to a lane-dense 128 output.
    out_ref[...] = jnp.dot(h, w5_ref[...],
                           preferred_element_type=jnp.float32) + b5_ref[...]


# --------------------------- params & forward -------------------------------

def init_params(key, n_features, n_classes, n_emb=3, n_hidden=128, d=2):
    ks = jax.random.split(key, 7)

    def lin(k, fan_in, fan_out):
        bound = float(fan_in) ** -0.5
        return jax.random.uniform(k, (fan_in, fan_out), jnp.float32, -bound, bound)

    p = {
        "emb": jax.random.normal(ks[0], (n_features, n_emb), jnp.float32),
        "w1": lin(ks[1], n_emb * d, n_hidden),
        "w2": lin(ks[2], n_hidden * d, n_hidden),
        "w3": lin(ks[3], n_hidden * d, n_hidden),
        "w4": lin(ks[4], n_hidden * d, n_hidden),
        "w5": lin(ks[5], n_hidden, n_classes),
        "b5": jax.random.uniform(ks[6], (1, n_classes), jnp.float32,
                                 -float(n_hidden) ** -0.5,
                                 float(n_hidden) ** -0.5),
    }
    for i in range(1, 5):  # BatchNorm affine params (torch defaults)
        p[f"g{i}"] = jnp.ones((1, n_hidden), jnp.float32)
        p[f"b{i}"] = jnp.zeros((1, n_hidden), jnp.float32)
    return p


def wavenet_forward(params, x, *, d=2, fuse_k=None):
    B, T = x.shape
    n_features, n_emb = params["emb"].shape
    n_hidden = params["w1"].shape[1]
    n_classes = params["w5"].shape[1]

    # Mirrors `assert x.dim() == 2` in the torch forward.
    assert T == d ** _N_STAGES, "Bigrams do not resolve. Choose different numbers"
    # Hard layout requirements (lane-dense activations, sublane-aligned row chunks).
    assert n_hidden % _LANE == 0, "n_hidden must be a multiple of 128"
    assert B % 8 == 0, "batch size must be a multiple of 8"
    if fuse_k is None:
        fuse_k = _use_fused_k()

    rows1 = (B * T) // d
    perm = jnp.asarray(_digit_reverse_perm(T, d), dtype=jnp.int32)
    idx = x.astype(jnp.int32)[:, perm].T.reshape(d, rows1)   # chunk-major token ids

    # Fold the embedding table into the stage-1 weight blocks: table_c = emb @ w1_c,
    # then the stage-1 pre-activation is a (tiny) gather + sum -- no K=3 matmul and no
    # lane-padded (R, 1) idx input ever reaches the kernel.
    w1_blocks = params["w1"].reshape(d, n_emb, n_hidden)
    tables = jnp.einsum("fe,deh->dfh", params["emb"], w1_blocks)   # (d, F, H)
    pre1 = tables[0][idx[0]]
    for c in range(1, d):
        pre1 = pre1 + tables[c][idx[c]]                            # (rows1, H)

    # Pad the classifier head to a lane-dense (>=128-wide) output block.
    ncp = max(_LANE, ((n_classes + _LANE - 1) // _LANE) * _LANE)
    w5p = jnp.zeros((n_hidden, ncp), jnp.float32).at[:, :n_classes].set(params["w5"])
    b5p = jnp.zeros((1, ncp), jnp.float32).at[:, :n_classes].set(params["b5"])

    args = (pre1, params["g1"], params["b1"],
            params["w2"], params["g2"], params["b2"],
            params["w3"], params["g3"], params["b3"],
            params["w4"], params["g4"], params["b4"],
            w5p, b5p)

    # Cost hint so XLA schedules correctly around the single fused custom call.
    rows = [B * T // d ** i for i in range(1, _N_STAGES + 1)]
    flops = sum(2 * rows[i] * (d * n_hidden) * n_hidden for i in range(1, _N_STAGES))
    flops += 2 * B * n_hidden * ncp
    transcendentals = sum(rows) * n_hidden
    bytes_accessed = sum(int(a.size) * 4 for a in args) + B * ncp * 4

    # Explicit scoped-VMEM budget (double-buffered inputs + headroom), capped at the
    # smallest physical VMEM across generations (v7x: 64 MiB).
    vmem_bytes = int(min(max(2 * bytes_accessed + (1 << 21), 32 << 20), 64 << 20))

    out = pl.pallas_call(
        functools.partial(_wavenet_kernel, d=d, fuse_k=fuse_k),
        out_shape=jax.ShapeDtypeStruct((B, ncp), jnp.float32),
        in_specs=[_VMEM] * len(args),
        out_specs=_VMEM,
        compiler_params=pltpu.CompilerParams(vmem_limit_bytes=vmem_bytes),
        cost_estimate=pl.CostEstimate(flops=flops,
                                      transcendentals=transcendentals,
                                      bytes_accessed=bytes_accessed),
    )(*args)
    return out[:, :n_classes]


# --------------------------- pure-JAX reference ------------------------------

def wavenet_ref(params, x, *, d=2):
    B, T = x.shape
    h = params["emb"][x].reshape(B * T, -1)
    rows = B * T
    for i in range(1, 5):
        rows //= d
        h = h.reshape(rows, -1)
        h = h @ params[f"w{i}"]
        mean = h.mean(0, keepdims=True)
        var = ((h - mean) ** 2).mean(0, keepdims=True)
        h = (h - mean) / jnp.sqrt(var + EPS)
        h = jnp.tanh(h * params[f"g{i}"] + params[f"b{i}"])
    return h @ params["w5"] + params["b5"]


# --------------------------------- main ---------------------------------------

if __name__ == "__main__":
    key = jax.random.PRNGKey(0)
    k_par, k_x = jax.random.split(key)

    # T must equal dilation_factor**4 so the sequence resolves to a 2-D tensor.
    B, T = 8, 16
    n_features, n_classes, n_emb, n_hidden, d = 7, 5, 3, 128, 2

    params = init_params(k_par, n_features, n_classes, n_emb, n_hidden, d)
    x = jax.random.randint(k_x, (B, T), 0, n_features, dtype=jnp.int32)

    out = jax.block_until_ready(wavenet_forward(params, x, d=d))
    ref = wavenet_ref(params, x, d=d)

    assert out.shape == (B, n_classes)
    assert jnp.allclose(out, ref, atol=2e-4, rtol=2e-4)
    print("KERNEL_OK")
</pallas_src>

<mosaic_0001>
module attributes {stable_mosaic.version = 11 : i64} {
  func.func @_wavenet_kernel(%arg0: memref<64x128xf32, #tpu.memory_space<vmem>>, %arg1: memref<1x128xf32, #tpu.memory_space<vmem>>, %arg2: memref<1x128xf32, #tpu.memory_space<vmem>>, %arg3: memref<256x128xf32, #tpu.memory_space<vmem>>, %arg4: memref<1x128xf32, #tpu.memory_space<vmem>>, %arg5: memref<1x128xf32, #tpu.memory_space<vmem>>, %arg6: memref<256x128xf32, #tpu.memory_space<vmem>>, %arg7: memref<1x128xf32, #tpu.memory_space<vmem>>, %arg8: memref<1x128xf32, #tpu.memory_space<vmem>>, %arg9: memref<256x128xf32, #tpu.memory_space<vmem>>, %arg10: memref<1x128xf32, #tpu.memory_space<vmem>>, %arg11: memref<1x128xf32, #tpu.memory_space<vmem>>, %arg12: memref<128x128xf32, #tpu.memory_space<vmem>>, %arg13: memref<1x128xf32, #tpu.memory_space<vmem>>, %arg14: memref<8x128xf32, #tpu.memory_space<vmem>>) attributes {dimension_semantics = [], scalar_prefetch = 0 : i64, scratch_operands = 0 : i64, tpu.core_type = #tpu.core_type<tc>} {
    %c0 = arith.constant 0 : index
    %c0_0 = arith.constant 0 : index
    %0 = vector.load %arg0[%c0, %c0_0] : memref<64x128xf32, #tpu.memory_space<vmem>>, vector<64x128xf32>
    %cst = arith.constant dense<0.000000e+00> : vector<128xf32>
    %1 = vector.multi_reduction <add>, %0, %cst [0] : vector<64x128xf32> to vector<128xf32>
    %2 = vector.shape_cast %1 : vector<128xf32> to vector<1x128xf32>
    %cst_1 = arith.constant 1.562500e-02 : f32
    %3 = vector.broadcast %cst_1 : f32 to vector<1x128xf32>
    %4 = arith.mulf %2, %3 : vector<1x128xf32>
    %5 = vector.broadcast %4 : vector<1x128xf32> to vector<64x128xf32>
    %6 = arith.subf %0, %5 : vector<64x128xf32>
    %7 = arith.mulf %6, %6 : vector<64x128xf32>
    %cst_2 = arith.constant dense<0.000000e+00> : vector<128xf32>
    %8 = vector.multi_reduction <add>, %7, %cst_2 [0] : vector<64x128xf32> to vector<128xf32>
    %9 = vector.shape_cast %8 : vector<128xf32> to vector<1x128xf32>
    %cst_3 = arith.constant 1.562500e-02 : f32
    %10 = vector.broadcast %cst_3 : f32 to vector<1x128xf32>
    %11 = arith.mulf %9, %10 : vector<1x128xf32>
    %c0_4 = arith.constant 0 : index
    %c0_5 = arith.constant 0 : index
    %12 = vector.load %arg1[%c0_4, %c0_5] : memref<1x128xf32, #tpu.memory_space<vmem>>, vector<1x128xf32>
    %cst_6 = arith.constant 9.99999974E-6 : f32
    %13 = vector.broadcast %cst_6 : f32 to vector<1x128xf32>
    %14 = arith.addf %11, %13 : vector<1x128xf32>
    %15 = math.rsqrt %14 : vector<1x128xf32>
    %16 = arith.mulf %12, %15 : vector<1x128xf32>
    %17 = vector.broadcast %16 : vector<1x128xf32> to vector<64x128xf32>
    %18 = arith.mulf %6, %17 : vector<64x128xf32>
    %c0_7 = arith.constant 0 : index
    %c0_8 = arith.constant 0 : index
    %19 = vector.load %arg2[%c0_7, %c0_8] : memref<1x128xf32, #tpu.memory_space<vmem>>, vector<1x128xf32>
    %20 = vector.broadcast %19 : vector<1x128xf32> to vector<64x128xf32>
    %21 = arith.addf %18, %20 : vector<64x128xf32>
    %22 = math.tanh %21 : vector<64x128xf32>
    %23 = vector.extract_strided_slice %22 {offsets = [0, 0], sizes = [32, 128], strides = [1, 1]} : vector<64x128xf32> to vector<32x128xf32>
    %24 = vector.extract_strided_slice %22 {offsets = [32, 0], sizes = [32, 128], strides = [1, 1]} : vector<64x128xf32> to vector<32x128xf32>
    %25 = tpu.concatenate %23, %24 in 1 : vector<32x128xf32>, vector<32x128xf32> -> vector<32x256xf32>
    %c0_9 = arith.constant 0 : index
    %c0_10 = arith.constant 0 : index
    %26 = vector.load %arg3[%c0_9, %c0_10] : memref<256x128xf32, #tpu.memory_space<vmem>>, vector<256x128xf32>
    %cst_11 = arith.constant dense<0.000000e+00> : vector<32x128xf32>
    %27 = tpu.matmul %25, %26, %cst_11 {dimension_numbers = #tpu.dot_dimension_numbers<[1], [0], [0], [1], [0, 0, 1, 1], [], []>} : vector<32x256xf32>, vector<256x128xf32>, vector<32x128xf32> -> vector<32x128xf32>
    %cst_12 = arith.constant dense<0.000000e+00> : vector<128xf32>
    %28 = vector.multi_reduction <add>, %27, %cst_12 [0] : vector<32x128xf32> to vector<128xf32>
    %29 = vector.shape_cast %28 : vector<128xf32> to vector<1x128xf32>
    %cst_13 = arith.constant 3.125000e-02 : f32
    %30 = vector.broadcast %cst_13 : f32 to vector<1x128xf32>
    %31 = arith.mulf %29, %30 : vector<1x128xf32>
    %32 = vector.broadcast %31 : vector<1x128xf32> to vector<32x128xf32>
    %33 = arith.subf %27, %32 : vector<32x128xf32>
    %34 = arith.mulf %33, %33 : vector<32x128xf32>
    %cst_14 = arith.constant dense<0.000000e+00> : vector<128xf32>
    %35 = vector.multi_reduction <add>, %34, %cst_14 [0] : vector<32x128xf32> to vector<128xf32>
    %36 = vector.shape_cast %35 : vector<128xf32> to vector<1x128xf32>
    %cst_15 = arith.constant 3.125000e-02 : f32
    %37 = vector.broadcast %cst_15 : f32 to vector<1x128xf32>
    %38 = arith.mulf %36, %37 : vector<1x128xf32>
    %c0_16 = arith.constant 0 : index
    %c0_17 = arith.constant 0 : index
    %39 = vector.load %arg4[%c0_16, %c0_17] : memref<1x128xf32, #tpu.memory_space<vmem>>, vector<1x128xf32>
    %cst_18 = arith.constant 9.99999974E-6 : f32
    %40 = vector.broadcast %cst_18 : f32 to vector<1x128xf32>
    %41 = arith.addf %38, %40 : vector<1x128xf32>
    %42 = math.rsqrt %41 : vector<1x128xf32>
    %43 = arith.mulf %39, %42 : vector<1x128xf32>
    %44 = vector.broadcast %43 : vector<1x128xf32> to vector<32x128xf32>
    %45 = arith.mulf %33, %44 : vector<32x128xf32>
    %c0_19 = arith.constant 0 : index
    %c0_20 = arith.constant 0 : index
    %46 = vector.load %arg5[%c0_19, %c0_20] : memref<1x128xf32, #tpu.memory_space<vmem>>, vector<1x128xf32>
    %47 = vector.broadcast %46 : vector<1x128xf32> to vector<32x128xf32>
    %48 = arith.addf %45, %47 : vector<32x128xf32>
    %49 = math.tanh %48 : vector<32x128xf32>
    %50 = vector.extract_strided_slice %49 {offsets = [0, 0], sizes = [16, 128], strides = [1, 1]} : vector<32x128xf32> to vector<16x128xf32>
    %51 = vector.extract_strided_slice %49 {offsets = [16, 0], sizes = [16, 128], strides = [1, 1]} : vector<32x128xf32> to vector<16x128xf32>
    %52 = tpu.concatenate %50, %51 in 1 : vector<16x128xf32>, vector<16x128xf32> -> vector<16x256xf32>
    %c0_21 = arith.constant 0 : index
    %c0_22 = arith.constant 0 : index
    %53 = vector.load %arg6[%c0_21, %c0_22] : memref<256x128xf32, #tpu.memory_space<vmem>>, vector<256x128xf32>
    %cst_23 = arith.constant dense<0.000000e+00> : vector<16x128xf32>
    %54 = tpu.matmul %52, %53, %cst_23 {dimension_numbers = #tpu.dot_dimension_numbers<[1], [0], [0], [1], [0, 0, 1, 1], [], []>} : vector<16x256xf32>, vector<256x128xf32>, vector<16x128xf32> -> vector<16x128xf32>
    %cst_24 = arith.constant dense<0.000000e+00> : vector<128xf32>
    %55 = vector.multi_reduction <add>, %54, %cst_24 [0] : vector<16x128xf32> to vector<128xf32>
    %56 = vector.shape_cast %55 : vector<128xf32> to vector<1x128xf32>
    %cst_25 = arith.constant 6.250000e-02 : f32
    %57 = vector.broadcast %cst_25 : f32 to vector<1x128xf32>
    %58 = arith.mulf %56, %57 : vector<1x128xf32>
    %59 = vector.broadcast %58 : vector<1x128xf32> to vector<16x128xf32>
    %60 = arith.subf %54, %59 : vector<16x128xf32>
    %61 = arith.mulf %60, %60 : vector<16x128xf32>
    %cst_26 = arith.constant dense<0.000000e+00> : vector<128xf32>
    %62 = vector.multi_reduction <add>, %61, %cst_26 [0] : vector<16x128xf32> to vector<128xf32>
    %63 = vector.shape_cast %62 : vector<128xf32> to vector<1x128xf32>
    %cst_27 = arith.constant 6.250000e-02 : f32
    %64 = vector.broadcast %cst_27 : f32 to vector<1x128xf32>
    %65 = arith.mulf %63, %64 : vector<1x128xf32>
    %c0_28 = arith.constant 0 : index
    %c0_29 = arith.constant 0 : index
    %66 = vector.load %arg7[%c0_28, %c0_29] : memref<1x128xf32, #tpu.memory_space<vmem>>, vector<1x128xf32>
    %cst_30 = arith.constant 9.99999974E-6 : f32
    %67 = vector.broadcast %cst_30 : f32 to vector<1x128xf32>
    %68 = arith.addf %65, %67 : vector<1x128xf32>
    %69 = math.rsqrt %68 : vector<1x128xf32>
    %70 = arith.mulf %66, %69 : vector<1x128xf32>
    %71 = vector.broadcast %70 : vector<1x128xf32> to vector<16x128xf32>
    %72 = arith.mulf %60, %71 : vector<16x128xf32>
    %c0_31 = arith.constant 0 : index
    %c0_32 = arith.constant 0 : index
    %73 = vector.load %arg8[%c0_31, %c0_32] : memref<1x128xf32, #tpu.memory_space<vmem>>, vector<1x128xf32>
    %74 = vector.broadcast %73 : vector<1x128xf32> to vector<16x128xf32>
    %75 = arith.addf %72, %74 : vector<16x128xf32>
    %76 = math.tanh %75 : vector<16x128xf32>
    %77 = vector.extract_strided_slice %76 {offsets = [0, 0], sizes = [8, 128], strides = [1, 1]} : vector<16x128xf32> to vector<8x128xf32>
    %78 = vector.extract_strided_slice %76 {offsets = [8, 0], sizes = [8, 128], strides = [1, 1]} : vector<16x128xf32> to vector<8x128xf32>
    %79 = tpu.concatenate %77, %78 in 1 : vector<8x128xf32>, vector<8x128xf32> -> vector<8x256xf32>
    %c0_33 = arith.constant 0 : index
    %c0_34 = arith.constant 0 : index
    %80 = vector.load %arg9[%c0_33, %c0_34] : memref<256x128xf32, #tpu.memory_space<vmem>>, vector<256x128xf32>
    %cst_35 = arith.constant dense<0.000000e+00> : vector<8x128xf32>
    %81 = tpu.matmul %79, %80, %cst_35 {dimension_numbers = #tpu.dot_dimension_numbers<[1], [0], [0], [1], [0, 0, 1, 1], [], []>} : vector<8x256xf32>, vector<256x128xf32>, vector<8x128xf32> -> vector<8x128xf32>
    %cst_36 = arith.constant dense<0.000000e+00> : vector<128xf32>
    %82 = vector.multi_reduction <add>, %81, %cst_36 [0] : vector<8x128xf32> to vector<128xf32>
    %83 = vector.shape_cast %82 : vector<128xf32> to vector<1x128xf32>
    %cst_37 = arith.constant 1.250000e-01 : f32
    %84 = vector.broadcast %cst_37 : f32 to vector<1x128xf32>
    %85 = arith.mulf %83, %84 : vector<1x128xf32>
    %86 = vector.broadcast %85 : vector<1x128xf32> to vector<8x128xf32>
    %87 = arith.subf %81, %86 : vector<8x128xf32>
    %88 = arith.mulf %87, %87 : vector<8x128xf32>
    %cst_38 = arith.constant dense<0.000000e+00> : vector<128xf32>
    %89 = vector.multi_reduction <add>, %88, %cst_38 [0] : vector<8x128xf32> to vector<128xf32>
    %90 = vector.shape_cast %89 : vector<128xf32> to vector<1x128xf32>
    %cst_39 = arith.constant 1.250000e-01 : f32
    %91 = vector.broadcast %cst_39 : f32 to vector<1x128xf32>
    %92 = arith.mulf %90, %91 : vector<1x128xf32>
    %c0_40 = arith.constant 0 : index
    %c0_41 = arith.constant 0 : index
    %93 = vector.load %arg10[%c0_40, %c0_41] : memref<1x128xf32, #tpu.memory_space<vmem>>, vector<1x128xf32>
    %cst_42 = arith.constant 9.99999974E-6 : f32
    %94 = vector.broadcast %cst_42 : f32 to vector<1x128xf32>
    %95 = arith.addf %92, %94 : vector<1x128xf32>
    %96 = math.rsqrt %95 : vector<1x128xf32>
    %97 = arith.mulf %93, %96 : vector<1x128xf32>
    %98 = vector.broadcast %97 : vector<1x128xf32> to vector<8x128xf32>
    %99 = arith.mulf %87, %98 : vector<8x128xf32>
    %c0_43 = arith.constant 0 : index
    %c0_44 = arith.constant 0 : index
    %100 = vector.load %arg11[%c0_43, %c0_44] : memref<1x128xf32, #tpu.memory_space<vmem>>, vector<1x128xf32>
    %101 = vector.broadcast %100 : vector<1x128xf32> to vector<8x128xf32>
    %102 = arith.addf %99, %101 : vector<8x128xf32>
    %103 = math.tanh %102 : vector<8x128xf32>
    %c0_45 = arith.constant 0 : index
    %c0_46 = arith.constant 0 : index
    %104 = vector.load %arg12[%c0_45, %c0_46] : memref<128x128xf32, #tpu.memory_space<vmem>>, vector<128x128xf32>
    %cst_47 = arith.constant dense<0.000000e+00> : vector<8x128xf32>
    %105 = tpu.matmul %103, %104, %cst_47 {dimension_numbers = #tpu.dot_dimension_numbers<[1], [0], [0], [1], [0, 0, 1, 1], [], []>} : vector<8x128xf32>, vector<128x128xf32>, vector<8x128xf32> -> vector<8x128xf32>
    %c0_48 = arith.constant 0 : index
    %c0_49 = arith.constant 0 : index
    %106 = vector.load %arg13[%c0_48, %c0_49] : memref<1x128xf32, #tpu.memory_space<vmem>>, vector<1x128xf32>
    %107 = vector.broadcast %106 : vector<1x128xf32> to vector<8x128xf32>
    %108 = arith.addf %105, %107 : vector<8x128xf32>
    %c0_50 = arith.constant 0 : index
    %c0_51 = arith.constant 0 : index
    %109 = vector.load %arg14[%c0_50, %c0_51] : memref<8x128xf32, #tpu.memory_space<vmem>>, vector<8x128xf32>
    tpu.vector_store %arg14[%c0_50, %c0_51], %108 {strides = array<i32>} : memref<8x128xf32, #tpu.memory_space<vmem>>, vector<8x128xf32>,
    return
  }
}

</mosaic_0001>

<bundles_post_ra>
// kernel: tpu_custom_call.1
= control target key start
LH: loop header
LB: loop body
LE: loop exit
PB: predicated region body
PF: predicated region fallthrough
CT: control target
= control target key end

     0   :  { %19 = vsyncpa [#allocation3], 0  ;;  %s1485_s0 = inlined_call_operand.hbm [shape: f32[64,128], index: 0, kind: input, shape index: {}]   ;;  %s1486_s1 = inlined_call_operand.vmem [shape: f32[1,128], index: 1, kind: input, shape index: {}]   ;;  %s1487_s2 = inlined_call_operand.vmem [shape: f32[1,128], index: 2, kind: input, shape index: {}]   ;;  %s1488_s3 = inlined_call_operand.hbm [shape: f32[256,128], index: 3, kind: input, shape index: {}]   ;;  %s1489_s4 = inlined_call_operand.vmem [shape: f32[1,128], index: 4, kind: input, shape index: {}]   ;;  %s1490_s5 = inlined_call_operand.vmem [shape: f32[1,128], index: 5, kind: input, shape index: {}]   ;;  %s1491_s6 = inlined_call_operand.hbm [shape: f32[256,128], index: 6, kind: input, shape index: {}]   ;;  %s1492_s7 = inlined_call_operand.vmem [shape: f32[1,128], index: 7, kind: input, shape index: {}]   ;;  %s1493_s8 = inlined_call_operand.vmem [shape: f32[1,128], index: 8, kind: input, shape index: {}]   ;;  %s1494_s9 = inlined_call_operand.hbm [shape: f32[256,128], index: 9, kind: input, shape index: {}]   ;;  %s1495_s10 = inlined_call_operand.vmem [shape: f32[1,128], index: 10, kind: input, shape index: {}]   ;;  %s1496_s11 = inlined_call_operand.vmem [shape: f32[1,128], index: 11, kind: input, shape index: {}]   ;;  %s1497_s12 = inlined_call_operand.hbm [shape: f32[128,128], index: 12, kind: input, shape index: {}]   ;;  %s1498_s13 = inlined_call_operand.vmem [shape: f32[1,128], index: 13, kind: input, shape index: {}]   ;;  %s1499_s14 = inlined_call_operand.hbm [shape: f32[8,128], index: 14, kind: output, shape index: {}]  }
   0x1   :  { %20 = vsyncpa [#allocation6], 0 }
   0x2   :  { %21 = vsyncpa [#allocation9], 0 }
   0x3   :  { %22 = vsyncpa [#allocation4], 0  ;;  %s1265_s29 = smov [#allocation5]   ;;  %s1266_s15 = smov [#allocation8]  }
   0x4   :  { %s44_s30 = sshll.u32 %s1265_s29, 4  ;;  %s76_s16 = sshll.u32 %s1266_s15, 4  ;;  %s45_s30 = int_to_ptr.vmem [resolvable:$true] %s44_s30  ;;  %s1351_s16 = int_to_ptr.vmem [resolvable:$true] %s76_s16 }
   0x5   :  { %s1125_s19 = scalar_lea.hbm %s1488_s3, 4096 }
   0x6   :  { %p1126_p0 = scmp.ne.s32.totalorder %s1488_s3, %s1125_s19  ;;  %p1129_p1 = scmp.lt.u32.totalorder %s1125_s19, %s1488_s3 }
   0x8   :  { %p1131_p2 = pnand %p1129_p1, %p1126_p0 }
   0xa   :  { %1134 = shalt.err (!%p1131_p2)
}
   0xb   :  { %s1135_s24 = scalar_lea.vmem %s45_s30, 4096  ;;  %p1140_p4 = scmp.lt.s32.totalorder %s45_s30, %s45_s30 }
   0xc   :  { %p1136_p3 = scmp.ne.s32.totalorder %s45_s30, %s1135_s24  ;;  %p1141_p5 = scmp.lt.s32.totalorder %s1135_s24, %s1135_s24 }
   0xe   :  { %p1142_p6 = por %p1141_p5, %p1140_p4 }
  0x10   :  { %p1143_p7 = pnand %p1142_p6, %p1136_p3 }
  0x12   :  { %1146 = shalt.err (!%p1143_p7)
}
  0x13   :  { %s1267_s25 = smov 128   ;;  %s1268_s26 = smov 8  }
  0x14   :  { %50 = dma.hbm_to_vmem [thread:$0]  %s1488_s3, 4096, %s45_s30, [#allocation6], %s1267_s25, %s1267_s25, %s1268_s26  }
  0x15   :  { %s1147_s17 = scalar_lea.hbm %s1494_s9, 4096 }
  0x16   :  { %p1148_p8 = scmp.ne.s32.totalorder %s1494_s9, %s1147_s17  ;;  %p1151_p9 = scmp.lt.u32.totalorder %s1147_s17, %s1494_s9 }
  0x18   :  { %p1153_p10 = pnand %p1151_p9, %p1148_p8 }
  0x1a   :  { %1156 = shalt.err (!%p1153_p10)
}
  0x1b   :  { %s1157_s22 = scalar_lea.vmem %s1351_s16, 4096  ;;  %p1162_p12 = scmp.lt.s32.totalorder %s1351_s16, %s1351_s16 }
  0x1c   :  { %p1158_p11 = scmp.ne.s32.totalorder %s1351_s16, %s1157_s22  ;;  %p1163_p13 = scmp.lt.s32.totalorder %s1157_s22, %s1157_s22 }
  0x1e   :  { %p1164_p0 = por %p1163_p13, %p1162_p12 }
  0x20   :  { %p1165_p1 = pnand %p1164_p0, %p1158_p11 }
  0x22   :  { %1168 = shalt.err (!%p1165_p1)
}
  0x23   :  { %82 = dma.hbm_to_vmem [thread:$0]  %s1494_s9, 4096, %s1351_s16, [#allocation9], %s1267_s25, %s1267_s25, %s1268_s26  }
  0x24   :  { %s1269_s23 = smov [#allocation2]   ;;  %s1270_s27 = smov [#allocation7]  }
  0x25   :  { %s28_s24 = sshll.u32 %s1269_s23, 4  ;;  %s60_s28 = sshll.u32 %s1270_s27, 4  ;;  %s29_s24 = int_to_ptr.vmem [resolvable:$true] %s28_s24  ;;  %s1388_s28 = int_to_ptr.vmem [resolvable:$true] %s60_s28 }
  0x26   :  { %s1169_s17 = scalar_lea.hbm %s1485_s0, 1024 }
  0x27   :  { %p1170_p2 = scmp.ne.s32.totalorder %s1485_s0, %s1169_s17  ;;  %p1173_p3 = scmp.lt.u32.totalorder %s1169_s17, %s1485_s0 }
  0x29   :  { %p1175_p4 = pnand %p1173_p3, %p1170_p2 }
  0x2b   :  { %1178 = shalt.err (!%p1175_p4)
}
  0x2c   :  { %s1179_s9 = scalar_lea.vmem %s29_s24, 1024  ;;  %p1184_p6 = scmp.lt.s32.totalorder %s29_s24, %s29_s24 }
  0x2d   :  { %p1180_p5 = scmp.ne.s32.totalorder %s29_s24, %s1179_s9  ;;  %p1185_p7 = scmp.lt.s32.totalorder %s1179_s9, %s1179_s9 }
  0x2f   :  { %p1186_p8 = por %p1185_p7, %p1184_p6 }
  0x31   :  { %p1187_p9 = pnand %p1186_p8, %p1180_p5 }
  0x33   :  { %1190 = shalt.err (!%p1187_p9)
}
  0x34   :  { %34 = dma.hbm_to_vmem [thread:$0]  %s1485_s0, 1024, %s29_s24, [#allocation3], %s1267_s25, %s1267_s25, %s1268_s26  }
  0x35   :  { %s1191_s23 = scalar_lea.hbm %s1491_s6, 4096 }
  0x36   :  { %p1192_p10 = scmp.ne.s32.totalorder %s1491_s6, %s1191_s23  ;;  %p1195_p11 = scmp.lt.u32.totalorder %s1191_s23, %s1491_s6 }
  0x38   :  { %p1197_p12 = pnand %p1195_p11, %p1192_p10 }
  0x3a   :  { %1200 = shalt.err (!%p1197_p12)
}
  0x3b   :  { %s1201_s18 = scalar_lea.vmem %s1388_s28, 4096  ;;  %p1206_p0 = scmp.lt.s32.totalorder %s1388_s28, %s1388_s28 }
  0x3c   :  { %p1202_p13 = scmp.ne.s32.totalorder %s1388_s28, %s1201_s18  ;;  %p1207_p1 = scmp.lt.s32.totalorder %s1201_s18, %s1201_s18 }
  0x3e   :  { %p1208_p2 = por %p1207_p1, %p1206_p0 }
  0x40   :  { %p1209_p3 = pnand %p1208_p2, %p1202_p13 }
  0x42   :  { %1212 = shalt.err (!%p1209_p3)
}
  0x43   :  { %66 = dma.hbm_to_vmem [thread:$0]  %s1491_s6, 4096, %s1388_s28, [#allocation6], %s1267_s25, %s1267_s25, %s1268_s26  }
  0x44   :  { %s1271_s19 = smov [#allocation10]   ;;  %s1213_s16 = scalar_lea.hbm %s1497_s12, 2048 }
  0x45   :  { %s92_s20 = sshll.u32 %s1271_s19, 4  ;;  %p1214_p4 = scmp.ne.s32.totalorder %s1497_s12, %s1213_s16  ;;  %s93_s20 = int_to_ptr.vmem [resolvable:$true] %s92_s20 }
  0x46   :  { %p1217_p5 = scmp.lt.u32.totalorder %s1213_s16, %s1497_s12 }
  0x48   :  { %p1219_p6 = pnand %p1217_p5, %p1214_p4 }
  0x4a   :  { %1222 = shalt.err (!%p1219_p6)
}
  0x4b   :  { %s1223_s27 = scalar_lea.vmem %s93_s20, 2048  ;;  %p1228_p8 = scmp.lt.s32.totalorder %s93_s20, %s93_s20 }
  0x4c   :  { %p1224_p7 = scmp.ne.s32.totalorder %s93_s20, %s1223_s27  ;;  %p1229_p9 = scmp.lt.s32.totalorder %s1223_s27, %s1223_s27 }
  0x4e   :  { %p1230_p10 = por %p1229_p9, %p1228_p8 }
  0x50   :  { %p1231_p11 = pnand %p1230_p10, %p1224_p7 }
  0x52   :  { %1234 = shalt.err (!%p1231_p11)
}
  0x53   :  { %98 = dma.hbm_to_vmem [thread:$0]  %s1497_s12, 2048, %s93_s20, [#allocation9], %s1267_s25, %s1267_s25, %s1268_s26  }
  0x54   :  { %1257 = dma.done.wait [#allocation3], 1024  }
  0x55   :  { %1258 = vsyncadd [#allocation3], 4294966272 }
  0x56   :  { %1259 = dma.done.wait [#allocation6], 8192  }
  0x57   :  { %1260 = vsyncadd [#allocation6], 4294959104 }
  0x58   :  { %1261 = dma.done.wait [#allocation9], 6144  }
  0x59   :  { %1262 = vsyncadd [#allocation9], 4294961152  ;;  %v225_v0 = vld [vmem:[#allocation5 + $0x80] sm:$0xff]  ;;  %v226_v1 = vld [vmem:[#allocation5 + $0x88] sm:$0xff]  ;;  %vm1273_vm0 = vmmov 0   ;;  %s1275_s9 = smov [#allocation11]  }
  0x5a   :  { %v209_v2 = vld [vmem:[#allocation5] sm:$0xff]  ;;  %v956_v3 = vpack.c.bf16 %v226_v1, %v225_v0  ;;  %v210_v4 = vld [vmem:[#allocation5 + $0x8] sm:$0xff]  ;;  %v227_v5 = vld [vmem:[#allocation5 + $0x90] sm:$0xff]  ;;  %s771_s16 = sshll.u32 %s1275_s9, 4  ;;  %s772_s16 = int_to_ptr.vmem [resolvable:$true] %s771_s16 }
  0x5b   :  { %v228_v6 = vld [vmem:[#allocation5 + $0x98] sm:$0xff]  ;;  %v958_v7 = vpack.c.bf16 %v210_v4, %v209_v2  ;;  %v211_v9 = vld [vmem:[#allocation5 + $0x10] sm:$0xff]  ;;  %v229_v11 = vld [vmem:[#allocation5 + $0xa0] sm:$0xff]  ;;  %p1240_p13 = scmp.lt.s32.totalorder %s772_s16, %s772_s16 }
  0x5c   :  { %v960_v8 = vpack.c.bf16 %v228_v6, %v227_v5  ;;  %v212_v10 = vld [vmem:[#allocation5 + $0x18] sm:$0xff]  ;;  %957 = vmatprep.subr.bf16.mxu0 %v956_v3  ;;  %v230_v12 = vld [vmem:[#allocation5 + $0xa8] sm:$0xff]  ;;  %v213_v15 = vld [vmem:[#allocation5 + $0x20] sm:$0xff] }
  0x5d   :  { %959 = vmatpush3.bf16.msra.mxu0 %v958_v7  ;;  %v962_v13 = vpack.c.bf16 %v212_v10, %v211_v9  ;;  %v964_v14 = vpack.c.bf16 %v230_v12, %v229_v11  ;;  %v214_v16 = vld [vmem:[#allocation5 + $0x28] sm:$0xff]  ;;  %v231_v17 = vld [vmem:[#allocation5 + $0xb0] sm:$0xff]  ;;  %v232_v18 = vld [vmem:[#allocation5 + $0xb8] sm:$0xff] }
  0x5e   :  { %961 = vmatprep.subr.bf16.mxu0 %v960_v8  ;;  %v966_v19 = vpack.c.bf16 %v214_v16, %v213_v15  ;;  %v968_v20 = vpack.c.bf16 %v232_v18, %v231_v17  ;;  %v215_v21 = vld [vmem:[#allocation5 + $0x30] sm:$0xff]  ;;  %v216_v22 = vld [vmem:[#allocation5 + $0x38] sm:$0xff]  ;;  %v233_v23 = vld [vmem:[#allocation5 + $0xc0] sm:$0xff] }
  0x5f   :  { %v234_v24 = vld [vmem:[#allocation5 + $0xc8] sm:$0xff]  ;;  %v116_v25 = vld [vmem:[#allocation2] sm:$0xff]  ;;  %v118_v27 = vld [vmem:[#allocation2 + $0x10] sm:$0xff]  ;;  %v970_v28 = vpack.c.bf16 %v216_v22, %v215_v21 }
  0x60   :  { %v117_v26 = vld [vmem:[#allocation2 + $0x8] sm:$0xff]  ;;  %v972_v30 = vpack.c.bf16 %v234_v24, %v233_v23  ;;  %v217_v31 = vld [vmem:[#allocation5 + $0x40] sm:$0xff]  ;;  %v119_v33 = vld [vmem:[#allocation2 + $0x18] sm:$0xff] }
  0x61   :  { %963 = vmatpush3.bf16.msra.mxu0 %v962_v13  ;;  %v124_v29 = vadd.f32 %v117_v26, %v116_v25  ;;  %v218_v32 = vld [vmem:[#allocation5 + $0x48] sm:$0xff]  ;;  %v235_v34 = vld [vmem:[#allocation5 + $0xd0] sm:$0xff]  ;;  %v236_v35 = vld [vmem:[#allocation5 + $0xd8] sm:$0xff] }
  0x62   :  { %965 = vmatprep.subr.bf16.mxu0 %v964_v14  ;;  %v120_v37 = vld [vmem:[#allocation2 + $0x20] sm:$0xff]  ;;  %v974_v38 = vpack.c.bf16 %v218_v32, %v217_v31  ;;  %v976_v40 = vpack.c.bf16 %v236_v35, %v235_v34  ;;  %v219_v41 = vld [vmem:[#allocation5 + $0x50] sm:$0xff]  ;;  %v220_v42 = vld [vmem:[#allocation5 + $0x58] sm:$0xff] }
  0x63   :  { %v125_v36 = vadd.f32 %v124_v29, %v118_v27  ;;  %v121_v43 = vld [vmem:[#allocation2 + $0x28] sm:$0xff]  ;;  %v237_v44 = vld [vmem:[#allocation5 + $0xe0] sm:$0xff]  ;;  %v122_v47 = vld [vmem:[#allocation2 + $0x30] sm:$0xff]  ;;  %v978_v48 = vpack.c.bf16 %v220_v42, %v219_v41 }
  0x64   :  { %v238_v45 = vld [vmem:[#allocation5 + $0xe8] sm:$0xff]  ;;  %v221_v51 = vld [vmem:[#allocation5 + $0x60] sm:$0xff]  ;;  %v123_v53 = vld [vmem:[#allocation2 + $0x38] sm:$0xff] }
  0x65   :  { %967 = vmatpush3.bf16.msra.mxu0 %v966_v19  ;;  %v126_v39 = vadd.f32 %v125_v36, %v119_v33  ;;  %v980_v50 = vpack.c.bf16 %v238_v45, %v237_v44  ;;  %v222_v52 = vld [vmem:[#allocation5 + $0x68] sm:$0xff]  ;;  %v239_v54 = vld [vmem:[#allocation5 + $0xf0] sm:$0xff]  ;;  %v240_v55 = vld [vmem:[#allocation5 + $0xf8] sm:$0xff] }
  0x66   :  { %969 = vmatprep.subr.bf16.mxu0 %v968_v20  ;;  %v982_v57 = vpack.c.bf16 %v222_v52, %v221_v51  ;;  %v984_v59 = vpack.c.bf16 %v240_v55, %v239_v54  ;;  %v223_v60 = vld [vmem:[#allocation5 + $0x70] sm:$0xff]  ;;  %v224_v61 = vld [vmem:[#allocation5 + $0x78] sm:$0xff]  ;;  %v782_v45 = vld [vmem:[%s1487_s2] ss:$0 sm:$0xff] }
  0x67   :  { %v127_v46 = vadd.f32 %v126_v39, %v120_v37  ;;  %v986_v63 = vpack.c.bf16 %v224_v61, %v223_v60  ;;  %v168_v39 = vld [vmem:[%s1486_s1] sm:$0x1] }
  0x69   :  { %971 = vmatpush3.bf16.msra.mxu0 %v970_v28  ;;  %v128_v49 = vadd.f32 %v127_v46, %v121_v43 }
  0x6a   :  { %973 = vmatprep.subr.bf16.mxu0 %v972_v30 }
  0x6b   :  { %v129_v56 = vadd.f32 %v128_v49, %v122_v47 }
  0x6d   :  { %975 = vmatpush3.bf16.msra.mxu0 %v974_v38  ;;  %v130_v58 = vadd.f32 %v129_v56, %v123_v53 }
  0x6e   :  { %977 = vmatprep.subr.bf16.mxu0 %v976_v40 }
  0x6f   :  { %v131_v62 = vrot.slane %v130_v58, 4 }
  0x71   :  { %979 = vmatpush3.bf16.msra.mxu0 %v978_v48  ;;  %v132_v0 = vadd.f32 %v131_v62, %v130_v58 }
  0x72   :  { %981 = vmatprep.subr.bf16.mxu0 %v980_v50 }
  0x73   :  { %v133_v1 = vrot.slane %v132_v0, 2 }
  0x75   :  { %983 = vmatpush3.bf16.msra.mxu0 %v982_v57  ;;  %v134_v2 = vadd.f32 %v133_v1, %v132_v0 }
  0x76   :  { %985 = vmatprep.subr.bf16.mxu0 %v984_v59 }
  0x77   :  { %v135_v3 = vrot.slane %v134_v2, 1 }
  0x79   :  { %987 = vmatpush3.bf16.msra.mxu0 %v986_v63  ;;  %v136_v4 = vadd.f32 %v135_v3, %v134_v2 }
  0x7b   :  { %v137_v5 = vmul.f32 0.015625, %v136_v4 }
  0x7d   :  { %v138_v6 = vsub.f32 %v116_v25, %v137_v5  ;;  %v139_v7 = vsub.f32 %v117_v26, %v137_v5  ;;  %v140_v8 = vsub.f32 %v118_v27, %v137_v5  ;;  %v141_v9 = vsub.f32 %v119_v33, %v137_v5 }
  0x7e   :  { %v142_v10 = vsub.f32 %v120_v37, %v137_v5  ;;  %v143_v14 = vsub.f32 %v121_v43, %v137_v5  ;;  %v144_v17 = vsub.f32 %v122_v47, %v137_v5  ;;  %v145_v20 = vsub.f32 %v123_v53, %v137_v5  ;;  %v399_v5 = vld [vmem:[#allocation7 + $0x80] sm:$0xff] }
  0x7f   :  { %v146_v11 = vmul.f32 %v138_v6, %v138_v6  ;;  %v147_v12 = vmul.f32 %v139_v7, %v139_v7  ;;  %v148_v13 = vmul.f32 %v140_v8, %v140_v8  ;;  %v149_v15 = vmul.f32 %v141_v9, %v141_v9 }
  0x80   :  { %v150_v18 = vmul.f32 %v142_v10, %v142_v10  ;;  %v151_v21 = vmul.f32 %v143_v14, %v143_v14  ;;  %v152_v23 = vmul.f32 %v144_v17, %v144_v17  ;;  %v153_v28 = vmul.f32 %v145_v20, %v145_v20 }
  0x81   :  { %v154_v16 = vadd.f32 %v147_v12, %v146_v11  ;;  %v173_v37 = vlaneseq  ;;  %v401_v11 = vld [vmem:[#allocation7 + $0x90] sm:$0xff]  ;;  %v402_v12 = vld [vmem:[#allocation7 + $0x98] sm:$0xff] }
  0x83   :  { %v155_v19 = vadd.f32 %v154_v16, %v148_v13  ;;  %v174_v38 = vshrl.u32 %v173_v37, 7  ;;  %v992_v13 = vpack.c.bf16 %v402_v12, %v401_v11 }
  0x85   :  { %v156_v22 = vadd.f32 %v155_v19, %v149_v15  ;;  %v1443_v40 = vsub.s32 0, %v174_v38  ;;  %v386_v15 = vld [vmem:[#allocation7 + $0x18] sm:$0xff]  ;;  %v393_v38 = vld [vmem:[#allocation7 + $0x50] sm:$0xff] }
  0x87   :  { %v157_v24 = vadd.f32 %v156_v22, %v150_v18  ;;  %v404_v18 = vld [vmem:[#allocation7 + $0xa8] sm:$0xff] }
  0x89   :  { %v158_v25 = vadd.f32 %v157_v24, %v151_v21  ;;  %v388_v21 = vld [vmem:[#allocation7 + $0x28] sm:$0xff]  ;;  %v406_v24 = vld [vmem:[#allocation7 + $0xb8] sm:$0xff] }
  0x8b   :  { %v159_v26 = vadd.f32 %v158_v25, %v152_v23  ;;  %v405_v23 = vld [vmem:[#allocation7 + $0xb0] sm:$0xff] }
  0x8c   :  { %v389_v25 = vld [vmem:[#allocation7 + $0x30] sm:$0xff] }
  0x8d   :  { %v160_v27 = vadd.f32 %v159_v26, %v153_v28  ;;  %v1000_v28 = vpack.c.bf16 %v406_v24, %v405_v23  ;;  %v390_v26 = vld [vmem:[#allocation7 + $0x38] sm:$0xff] }
  0x8f   :  { %v161_v29 = vrot.slane %v160_v27, 4 }
  0x91   :  { %v162_v30 = vadd.f32 %v161_v29, %v160_v27  ;;  %v1002_v27 = vpack.c.bf16 %v390_v26, %v389_v25  ;;  %v407_v29 = vld [vmem:[#allocation7 + $0xc0] sm:$0xff] }
  0x93   :  { %v163_v31 = vrot.slane %v162_v30, 2 }
  0x95   :  { %v164_v32 = vadd.f32 %v163_v31, %v162_v30  ;;  %v408_v30 = vld [vmem:[#allocation7 + $0xc8] sm:$0xff] }
  0x96   :  { %v1004_v31 = vpack.c.bf16 %v408_v30, %v407_v29 }
  0x97   :  { %v165_v33 = vrot.slane %v164_v32, 1 }
  0x99   :  { %v166_v34 = vadd.f32 %v165_v33, %v164_v32  ;;  %v391_v32 = vld [vmem:[#allocation7 + $0x40] sm:$0xff]  ;;  %v392_v33 = vld [vmem:[#allocation7 + $0x48] sm:$0xff] }
  0x9b   :  { %v167_v35 = vmul.f32 0.015625, %v166_v34  ;;  %v1006_v34 = vpack.c.bf16 %v392_v33, %v391_v32 }
  0x9d   :  { %v169_v36 = vadd.f32 1e-05, %v167_v35  ;;  %v409_v35 = vld [vmem:[#allocation7 + $0xd0] sm:$0xff] }
  0x9f   :  { %1087 = vrsqrt.f32 %v169_v36  ;;  %v410_v36 = vld [vmem:[#allocation7 + $0xd8] sm:$0xff] }
  0xa0   :  { %v1008_v37 = vpack.c.bf16 %v410_v36, %v409_v35  ;;  %v783_v35 = vld [vmem:[%s1490_s5] ss:$0 sm:$0xff] }
  0xa9   :  { %v1088_v41 = vpop.eup %1087 }
  0xaa   :  { %v171_v42 = vmul.f32 %v1088_v41, %v168_v39  ;;  %v394_v39 = vld [vmem:[#allocation7 + $0x58] sm:$0xff] }
  0xab   :  { %v1010_v41 = vpack.c.bf16 %v394_v39, %v393_v38 }
  0xac   :  { %v176_v43 = vrot.slane %v171_v42, %v1443_v40  ;;  %v411_v42 = vld [vmem:[#allocation7 + $0xe0] sm:$0xff] }
  0xae   :  { %v178_v44 = vmul.f32 %v176_v43, %v138_v6  ;;  %v182_v46 = vmul.f32 %v176_v43, %v142_v10  ;;  %v183_v47 = vmul.f32 %v176_v43, %v143_v14  ;;  %v179_v48 = vmul.f32 %v176_v43, %v139_v7  ;;  %v400_v6 = vld [vmem:[#allocation7 + $0x88] sm:$0xff]  ;;  %v385_v14 = vld [vmem:[#allocation7 + $0x10] sm:$0xff] }
  0xaf   :  { %v184_v50 = vmul.f32 %v176_v43, %v144_v17  ;;  %v180_v53 = vmul.f32 %v176_v43, %v140_v8  ;;  %v185_v55 = vmul.f32 %v176_v43, %v145_v20  ;;  %v181_v57 = vmul.f32 %v176_v43, %v141_v9  ;;  %v383_v8 = vld [vmem:[#allocation7] sm:$0xff]  ;;  %v384_v9 = vld [vmem:[#allocation7 + $0x8] sm:$0xff] }
  0xb0   :  { %v193_v49 = vadd.f32 %v782_v45, %v178_v44  ;;  %v197_v51 = vadd.f32 %v782_v45, %v182_v46  ;;  %v198_v52 = vadd.f32 %v782_v45, %v183_v47  ;;  %v194_v54 = vadd.f32 %v782_v45, %v179_v48  ;;  %v403_v17 = vld [vmem:[#allocation7 + $0xa0] sm:$0xff]  ;;  %v412_v43 = vld [vmem:[#allocation7 + $0xe8] sm:$0xff]  ;;  %v413_v47 = vld [vmem:[#allocation7 + $0xf0] sm:$0xff] }
  0xb1   :  { %v199_v56 = vadd.f32 %v782_v45, %v184_v50  ;;  %v195_v58 = vadd.f32 %v782_v45, %v180_v53  ;;  %v200_v59 = vadd.f32 %v782_v45, %v185_v55  ;;  %v196_v60 = vadd.f32 %v782_v45, %v181_v57  ;;  %v387_v20 = vld [vmem:[#allocation7 + $0x20] sm:$0xff]  ;;  %v396_v46 = vld [vmem:[#allocation7 + $0x68] sm:$0xff]  ;;  %v414_v48 = vld [vmem:[#allocation7 + $0xf8] sm:$0xff] }
  0xb2   :  { %1089 = vtanh.f32 %v193_v49  ;;  %v988_v7 = vpack.c.bf16 %v400_v6, %v399_v5  ;;  %v990_v10 = vpack.c.bf16 %v384_v9, %v383_v8  ;;  %v994_v16 = vpack.c.bf16 %v386_v15, %v385_v14  ;;  %v395_v44 = vld [vmem:[#allocation7 + $0x60] sm:$0xff] }
  0xb3   :  { %1091 = vtanh.f32 %v197_v51  ;;  %v996_v19 = vpack.c.bf16 %v404_v18, %v403_v17  ;;  %v998_v22 = vpack.c.bf16 %v388_v21, %v387_v20  ;;  %v1012_v45 = vpack.c.bf16 %v412_v43, %v411_v42  ;;  %v397_v51 = vld [vmem:[#allocation7 + $0x70] sm:$0xff] }
  0xb4   :  { %1093 = vtanh.f32 %v198_v52  ;;  %989 = vmatprep.subr.bf16.mxu1 %v988_v7  ;;  %v1014_v49 = vpack.c.bf16 %v396_v46, %v395_v44  ;;  %v1016_v50 = vpack.c.bf16 %v414_v48, %v413_v47  ;;  %v398_v52 = vld [vmem:[#allocation7 + $0x78] sm:$0xff] }
  0xb5   :  { %1095 = vtanh.f32 %v194_v54  ;;  %991 = vmatpush3.bf16.msra.mxu1 %v990_v10  ;;  %v1018_v53 = vpack.c.bf16 %v398_v52, %v397_v51  ;;  %v533_v52 = vld [vmem:[#allocation8] sm:$0xff] }
  0xb6   :  { %1097 = vtanh.f32 %v199_v56  ;;  %993 = vmatprep.subr.bf16.mxu1 %v992_v13 }
  0xb7   :  { %1099 = vtanh.f32 %v195_v58 }
  0xb8   :  { %1101 = vtanh.f32 %v200_v59 }
  0xb9   :  { %1103 = vtanh.f32 %v196_v60  ;;  %995 = vmatpush3.bf16.msra.mxu1 %v994_v16 }
  0xba   :  { %997 = vmatprep.subr.bf16.mxu1 %v996_v19 }
  0xbc   :  { %v1090_v61 = vpop.eup %1089 }
  0xbd   :  { %v1092_v62 = vpop.eup %1091  ;;  %999 = vmatpush3.bf16.msra.mxu1 %v998_v22 }
  0xbe   :  { %v1094_v63 = vpop.eup %1093  ;;  %305 = vmatprep.mubr.f32.mxu0 %v1092_v62  ;;  %1001 = vmatprep.subr.bf16.mxu1 %v1000_v28 }
  0xbf   :  { %306 = vmatmul.mubr.f32.vlgmr.msra.gmra.mrb[0].mxu0 %v1090_v61  ;;  %v1096_v0 = vpop.eup %1095 }
  0xc0   :  { %310 = vmatprep.mubr.f32.mxu0 %v1094_v63  ;;  %v1098_v1 = vpop.eup %1097 }
  0xc1   :  { %v1100_v2 = vpop.eup %1099  ;;  %1003 = vmatpush3.bf16.msra.mxu1 %v1002_v27 }
  0xc2   :  { %v1102_v3 = vpop.eup %1101  ;;  %1005 = vmatprep.subr.bf16.mxu1 %v1004_v31  ;;  %v354_v31 = vld [vmem:[%s1489_s4] sm:$0x1] }
  0xc3   :  { %311 = vmatmul.mubr.f32.gmra.mrb[2].mxu0 %v1096_v0  ;;  %v1104_v4 = vpop.eup %1103 }
  0xc4   :  { %315 = vmatprep.mubr.f32.mxu0 %v1098_v1 }
  0xc5   :  { %1007 = vmatpush3.bf16.msra.mxu1 %v1006_v34 }
  0xc6   :  { %1009 = vmatprep.subr.bf16.mxu1 %v1008_v37 }
  0xc7   :  { %316 = vmatmul.mubr.f32.gmra.mrb[4].mxu0 %v1100_v2 }
  0xc8   :  { %320 = vmatprep.mubr.f32.mxu0 %v1102_v3 }
  0xc9   :  { %1011 = vmatpush3.bf16.msra.mxu1 %v1010_v41 }
  0xca   :  { %1013 = vmatprep.subr.bf16.mxu1 %v1012_v45 }
  0xcb   :  { %321 = vmatmul.mubr.f32.gmra.mrb[6].mxu0 %v1104_v4 }
  0xcd   :  { %1015 = vmatpush3.bf16.msra.mxu1 %v1014_v49  ;;  %v549_v49 = vld [vmem:[#allocation8 + $0x80] sm:$0xff] }
  0xce   :  { %1017 = vmatprep.subr.bf16.mxu1 %v1016_v50  ;;  %v550_v50 = vld [vmem:[#allocation8 + $0x88] sm:$0xff] }
  0xcf   :  { %v1020_v51 = vpack.c.bf16 %v550_v50, %v549_v49 }
  0xd1   :  { %1019 = vmatpush3.bf16.msra.mxu1 %v1018_v53  ;;  %v534_v53 = vld [vmem:[#allocation8 + $0x8] sm:$0xff]  ;;  %1021 = vmatprep.subr.bf16.mxu0 %v1020_v51 }
 0x192   :  { %v819_v54 = vpop.f32.mrb[0].mxu0 }
 0x193   :  { %v820_v55 = vpop.f32.mrb[1].mxu0 }
 0x194   :  { %v821_v56 = vadd.f32 %v820_v55, %v819_v54  ;;  %v1022_v54 = vpack.c.bf16 %v534_v53, %v533_v52  ;;  %v551_v55 = vld [vmem:[#allocation8 + $0x90] sm:$0xff] }
 0x196   :  { %v822_v57 = vpop.f32.mrb[2].mxu0  ;;  %1023 = vmatpush3.bf16.msra.mxu0 %v1022_v54 }
 0x197   :  { %v823_v58 = vpop.f32.mrb[3].mxu0 }
 0x198   :  { %v824_v59 = vadd.f32 %v823_v58, %v822_v57  ;;  %v535_v58 = vld [vmem:[#allocation8 + $0x10] sm:$0xff] }
 0x19a   :  { %v326_v60 = vadd.f32 %v824_v59, %v821_v56  ;;  %v825_v61 = vpop.f32.mrb[4].mxu0 }
 0x19b   :  { %v826_v62 = vpop.f32.mrb[5].mxu0 }
 0x19c   :  { %v827_v63 = vadd.f32 %v826_v62, %v825_v61  ;;  %v553_v61 = vld [vmem:[#allocation8 + $0xa0] sm:$0xff]  ;;  %v554_v62 = vld [vmem:[#allocation8 + $0xa8] sm:$0xff] }
 0x19e   :  { %v327_v0 = vadd.f32 %v827_v63, %v326_v60  ;;  %v828_v1 = vpop.f32.mrb[6].mxu0 }
 0x19f   :  { %v829_v2 = vpop.f32.mrb[7].mxu0 }
 0x1a0   :  { %v830_v3 = vadd.f32 %v829_v2, %v828_v1  ;;  %v538_v1 = vld [vmem:[#allocation8 + $0x28] sm:$0xff] }
 0x1a2   :  { %v328_v4 = vadd.f32 %v830_v3, %v327_v0  ;;  %v537_v0 = vld [vmem:[#allocation8 + $0x20] sm:$0xff] }
 0x1a3   :  { %v1030_v2 = vpack.c.bf16 %v538_v1, %v537_v0  ;;  %v784_v1 = vld [vmem:[%s1493_s8] ss:$0 sm:$0xff] }
 0x1a4   :  { %v329_v5 = vrot.slane %v328_v4, 4 }
 0x1a6   :  { %v330_v6 = vadd.f32 %v329_v5, %v328_v4  ;;  %v556_v4 = vld [vmem:[#allocation8 + $0xb8] sm:$0xff] }
 0x1a8   :  { %v331_v7 = vrot.slane %v330_v6, 2 }
 0x1aa   :  { %v332_v8 = vadd.f32 %v331_v7, %v330_v6  ;;  %v539_v6 = vld [vmem:[#allocation8 + $0x30] sm:$0xff]  ;;  %v540_v7 = vld [vmem:[#allocation8 + $0x38] sm:$0xff] }
 0x1ac   :  { %v333_v9 = vrot.slane %v332_v8, 1 }
 0x1ae   :  { %v334_v10 = vadd.f32 %v333_v9, %v332_v8  ;;  %v1034_v8 = vpack.c.bf16 %v540_v7, %v539_v6  ;;  %v557_v9 = vld [vmem:[#allocation8 + $0xc0] sm:$0xff] }
 0x1b0   :  { %v335_v11 = vmul.f32 0.03125, %v334_v10  ;;  %v558_v10 = vld [vmem:[#allocation8 + $0xc8] sm:$0xff] }
 0x1b2   :  { %v336_v12 = vsub.f32 %v821_v56, %v335_v11  ;;  %v337_v13 = vsub.f32 %v824_v59, %v335_v11  ;;  %v338_v14 = vsub.f32 %v827_v63, %v335_v11  ;;  %v339_v15 = vsub.f32 %v830_v3, %v335_v11  ;;  %v552_v56 = vld [vmem:[#allocation8 + $0x98] sm:$0xff]  ;;  %v555_v3 = vld [vmem:[#allocation8 + $0xb0] sm:$0xff] }
 0x1b3   :  { %v1024_v57 = vpack.c.bf16 %v552_v56, %v551_v55  ;;  %v536_v59 = vld [vmem:[#allocation8 + $0x18] sm:$0xff]  ;;  %v1028_v63 = vpack.c.bf16 %v554_v62, %v553_v61  ;;  %v1032_v5 = vpack.c.bf16 %v556_v4, %v555_v3  ;;  %v1036_v11 = vpack.c.bf16 %v558_v10, %v557_v9  ;;  %v510_v61 = vld [vmem:[%s1492_s7] sm:$0x1]  ;;  %v672_v9 = vld [vmem:[#allocation10 + $0x8] sm:$0xff] }
 0x1b4   :  { %v340_v16 = vmul.f32 %v336_v12, %v336_v12  ;;  %v341_v17 = vmul.f32 %v337_v13, %v337_v13  ;;  %v342_v18 = vmul.f32 %v338_v14, %v338_v14  ;;  %v343_v20 = vmul.f32 %v339_v15, %v339_v15 }
 0x1b5   :  { %v1026_v60 = vpack.c.bf16 %v536_v59, %v535_v58  ;;  %1025 = vmatprep.subr.bf16.mxu0 %v1024_v57 }
 0x1b6   :  { %v344_v19 = vadd.f32 %v341_v17, %v340_v16  ;;  %v560_v16 = vld [vmem:[#allocation8 + $0xd8] sm:$0xff] }
 0x1b7   :  { %1027 = vmatpush3.bf16.msra.mxu0 %v1026_v60 }
 0x1b8   :  { %v345_v21 = vadd.f32 %v344_v19, %v342_v18  ;;  %1029 = vmatprep.subr.bf16.mxu0 %v1028_v63  ;;  %v543_v18 = vld [vmem:[#allocation8 + $0x50] sm:$0xff]  ;;  %v544_v19 = vld [vmem:[#allocation8 + $0x58] sm:$0xff] }
 0x1ba   :  { %v346_v22 = vadd.f32 %v345_v21, %v343_v20  ;;  %v1042_v20 = vpack.c.bf16 %v544_v19, %v543_v18  ;;  %v561_v21 = vld [vmem:[#allocation8 + $0xe0] sm:$0xff]  ;;  %v677_v18 = vld [vmem:[#allocation10 + $0x30] sm:$0xff]  ;;  %v678_v19 = vld [vmem:[#allocation10 + $0x38] sm:$0xff] }
 0x1bb   :  { %1031 = vmatpush3.bf16.msra.mxu0 %v1030_v2 }
 0x1bc   :  { %v347_v23 = vrot.slane %v346_v22, 4  ;;  %1033 = vmatprep.subr.bf16.mxu0 %v1032_v5 }
 0x1be   :  { %v348_v24 = vadd.f32 %v347_v23, %v346_v22  ;;  %v562_v22 = vld [vmem:[#allocation8 + $0xe8] sm:$0xff]  ;;  %v545_v23 = vld [vmem:[#allocation8 + $0x60] sm:$0xff] }
 0x1bf   :  { %1035 = vmatpush3.bf16.msra.mxu0 %v1034_v8  ;;  %v671_v8 = vld [vmem:[#allocation10] sm:$0xff] }
 0x1c0   :  { %v349_v28 = vrot.slane %v348_v24, 2  ;;  %1037 = vmatprep.subr.bf16.mxu0 %v1036_v11  ;;  %v1053_v10 = vpack.c.bf16 %v672_v9, %v671_v8  ;;  %v1272_v11 = vmov 0.0|0.0  }
 0x1c1   :  { %1052 = vmatprep.subr.bf16.mxu1 %v1272_v11 }
 0x1c2   :  { %v350_v25 = vadd.f32 %v349_v28, %v348_v24  ;;  %v1044_v24 = vpack.c.bf16 %v562_v22, %v561_v21  ;;  %v546_v28 = vld [vmem:[#allocation8 + $0x68] sm:$0xff]  ;;  %v679_v21 = vld [vmem:[#allocation10 + $0x40] sm:$0xff] }
 0x1c3   :  { %v680_v22 = vld [vmem:[#allocation10 + $0x48] sm:$0xff] }
 0x1c4   :  { %v351_v26 = vrot.slane %v350_v25, 1 }
 0x1c6   :  { %v352_v27 = vadd.f32 %v351_v26, %v350_v25  ;;  %v563_v25 = vld [vmem:[#allocation8 + $0xf0] sm:$0xff]  ;;  %v564_v26 = vld [vmem:[#allocation8 + $0xf8] sm:$0xff] }
 0x1c8   :  { %v353_v29 = vmul.f32 0.03125, %v352_v27  ;;  %v1046_v27 = vpack.c.bf16 %v546_v28, %v545_v23  ;;  %v1065_v23 = vpack.c.bf16 %v680_v22, %v679_v21  ;;  %v682_v28 = vld [vmem:[#allocation10 + $0x58] sm:$0xff] }
 0x1ca   :  { %v355_v30 = vadd.f32 1e-05, %v353_v29  ;;  %v1048_v29 = vpack.c.bf16 %v564_v26, %v563_v25  ;;  %v683_v26 = vld [vmem:[#allocation10 + $0x60] sm:$0xff] }
 0x1cc   :  { %1105 = vrsqrt.f32 %v355_v30  ;;  %v547_v30 = vld [vmem:[#allocation8 + $0x70] sm:$0xff] }
 0x1d6   :  { %v1106_v32 = vpop.eup %1105 }
 0x1d7   :  { %v357_v33 = vmul.f32 %v1106_v32, %v354_v31  ;;  %v548_v31 = vld [vmem:[#allocation8 + $0x78] sm:$0xff] }
 0x1d8   :  { %v1050_v32 = vpack.c.bf16 %v548_v31, %v547_v30  ;;  %v685_v30 = vld [vmem:[#allocation10 + $0x70] sm:$0xff]  ;;  %v686_v31 = vld [vmem:[#allocation10 + $0x78] sm:$0xff] }
 0x1d9   :  { %v362_v34 = vrot.slane %v357_v33, %v1443_v40 }
 0x1db   :  { %v364_v36 = vmul.f32 %v362_v34, %v336_v12  ;;  %v365_v37 = vmul.f32 %v362_v34, %v337_v13  ;;  %v367_v38 = vmul.f32 %v362_v34, %v339_v15  ;;  %v366_v39 = vmul.f32 %v362_v34, %v338_v14  ;;  %v541_v12 = vld [vmem:[#allocation8 + $0x40] sm:$0xff]  ;;  %v542_v13 = vld [vmem:[#allocation8 + $0x48] sm:$0xff]  ;;  %v559_v15 = vld [vmem:[#allocation8 + $0xd0] sm:$0xff] }
 0x1dc   :  { %v1038_v14 = vpack.c.bf16 %v542_v13, %v541_v12  ;;  %v1040_v17 = vpack.c.bf16 %v560_v16, %v559_v15  ;;  %v673_v12 = vld [vmem:[#allocation10 + $0x10] sm:$0xff]  ;;  %v674_v13 = vld [vmem:[#allocation10 + $0x18] sm:$0xff]  ;;  %v675_v15 = vld [vmem:[#allocation10 + $0x20] sm:$0xff] }
 0x1dd   :  { %v375_v41 = vadd.f32 %v783_v35, %v364_v36  ;;  %v377_v42 = vadd.f32 %v783_v35, %v366_v39  ;;  %v378_v43 = vadd.f32 %v783_v35, %v367_v38  ;;  %v376_v44 = vadd.f32 %v783_v35, %v365_v37  ;;  %v676_v16 = vld [vmem:[#allocation10 + $0x28] sm:$0xff] }
 0x1de   :  { %1039 = vmatpush3.bf16.msra.mxu0 %v1038_v14  ;;  %v1056_v14 = vpack.c.bf16 %v674_v13, %v673_v12 }
 0x1df   :  { %1107 = vtanh.f32 %v375_v41  ;;  %1041 = vmatprep.subr.bf16.mxu0 %v1040_v17  ;;  %v1059_v17 = vpack.c.bf16 %v676_v16, %v675_v15 }
 0x1e0   :  { %1109 = vtanh.f32 %v377_v42 }
 0x1e1   :  { %1111 = vtanh.f32 %v378_v43 }
 0x1e2   :  { %1113 = vtanh.f32 %v376_v44  ;;  %1043 = vmatpush3.bf16.msra.mxu0 %v1042_v20  ;;  %v1062_v20 = vpack.c.bf16 %v678_v19, %v677_v18 }
 0x1e3   :  { %1045 = vmatprep.subr.bf16.mxu0 %v1044_v24  ;;  %v681_v24 = vld [vmem:[#allocation10 + $0x50] sm:$0xff] }
 0x1e4   :  { %v1068_v25 = vpack.c.bf16 %v682_v28, %v681_v24 }
 0x1e6   :  { %1047 = vmatpush3.bf16.msra.mxu0 %v1046_v27  ;;  %v684_v27 = vld [vmem:[#allocation10 + $0x68] sm:$0xff] }
 0x1e7   :  { %1049 = vmatprep.subr.bf16.mxu0 %v1048_v29  ;;  %v1071_v29 = vpack.c.bf16 %v684_v27, %v683_v26 }
 0x1e9   :  { %v1108_v45 = vpop.eup %1107 }
 0x1ea   :  { %v1110_v46 = vpop.eup %1109  ;;  %1051 = vmatpush3.bf16.msra.mxu0 %v1050_v32  ;;  %v1274_v32 = vmov 0.0  }
 0x1eb   :  { %479 = vmatprep.mubr.f32.mxu1 %v1110_v46  ;;  %v1112_v47 = vpop.eup %1111 }
 0x1ec   :  { %480 = vmatmul.mubr.f32.vlgmr.msra.gmra.mrb[0].mxu1 %v1108_v45  ;;  %v1114_v48 = vpop.eup %1113 }
 0x1ed   :  { %484 = vmatprep.mubr.f32.mxu1 %v1112_v47  ;;  %1054 = vmatpush3.bf16.msra.mxu1 %v1053_v10 }
 0x1ee   :  { %1055 = vmatprep.subr.bf16.mxu1 %v1272_v11 }
 0x1f0   :  { %485 = vmatmul.mubr.f32.gmra.mrb[2].mxu1 %v1114_v48 }
 0x1f1   :  { %1057 = vmatpush3.bf16.msra.mxu1 %v1056_v14  ;;  %953 = vmatprep.mubr.msk.f32.mxu1 %vm1273_vm0, %v1274_v32 }
 0x1f2   :  { %1058 = vmatprep.subr.bf16.mxu1 %v1272_v11 }
 0x1f5   :  { %1060 = vmatpush3.bf16.msra.mxu1 %v1059_v17 }
 0x1f6   :  { %1061 = vmatprep.subr.bf16.mxu1 %v1272_v11 }
 0x1f9   :  { %1063 = vmatpush3.bf16.msra.mxu1 %v1062_v20 }
 0x1fa   :  { %1064 = vmatprep.subr.bf16.mxu1 %v1272_v11 }
 0x1fd   :  { %1066 = vmatpush3.bf16.msra.mxu1 %v1065_v23 }
 0x1fe   :  { %1067 = vmatprep.subr.bf16.mxu1 %v1272_v11 }
 0x201   :  { %1069 = vmatpush3.bf16.msra.mxu1 %v1068_v25 }
 0x202   :  { %1070 = vmatprep.subr.bf16.mxu1 %v1272_v11 }
 0x205   :  { %1072 = vmatpush3.bf16.msra.mxu1 %v1071_v29 }
 0x206   :  { %1073 = vmatprep.subr.bf16.mxu1 %v1272_v11 }
 0x2bf   :  { %v863_v33 = vpop.f32.mrb[0].mxu1 }
 0x2c0   :  { %v864_v34 = vpop.f32.mrb[1].mxu1 }
 0x2c1   :  { %v865_v35 = vadd.f32 %v864_v34, %v863_v33  ;;  %v1074_v33 = vpack.c.bf16 %v686_v31, %v685_v30 }
 0x2c3   :  { %v866_v36 = vpop.f32.mrb[2].mxu1  ;;  %1075 = vmatpush3.bf16.msra.mxu1 %v1074_v33 }
 0x2c4   :  { %v867_v37 = vpop.f32.mrb[3].mxu1 }
 0x2c5   :  { %v868_v38 = vadd.f32 %v867_v37, %v866_v36 }
 0x2c7   :  { %v490_v39 = vadd.f32 %v868_v38, %v865_v35 }
 0x2c9   :  { %v491_v41 = vrot.slane %v490_v39, 4 }
 0x2cb   :  { %v492_v42 = vadd.f32 %v491_v41, %v490_v39 }
 0x2cd   :  { %v493_v43 = vrot.slane %v492_v42, 2 }
 0x2cf   :  { %v494_v44 = vadd.f32 %v493_v43, %v492_v42 }
 0x2d1   :  { %v495_v45 = vrot.slane %v494_v44, 1 }
 0x2d3   :  { %v496_v46 = vadd.f32 %v495_v45, %v494_v44 }
 0x2d5   :  { %v497_v47 = vmul.f32 0.0625, %v496_v46 }
 0x2d7   :  { %v498_v48 = vsub.f32 %v865_v35, %v497_v47  ;;  %v499_v49 = vsub.f32 %v868_v38, %v497_v47 }
 0x2d9   :  { %v500_v50 = vmul.f32 %v498_v48, %v498_v48  ;;  %v501_v51 = vmul.f32 %v499_v49, %v499_v49 }
 0x2db   :  { %v502_v52 = vadd.f32 %v501_v51, %v500_v50 }
 0x2dd   :  { %v503_v53 = vrot.slane %v502_v52, 4 }
 0x2df   :  { %v504_v54 = vadd.f32 %v503_v53, %v502_v52 }
 0x2e1   :  { %v505_v55 = vrot.slane %v504_v54, 2 }
 0x2e3   :  { %v506_v56 = vadd.f32 %v505_v55, %v504_v54  ;;  %v651_v55 = vld [vmem:[%s1495_s10] sm:$0x1]  ;;  %s1235_s10 = scalar_lea.vmem %s772_s16, 128 }
 0x2e4   :  { %p1236_p12 = scmp.ne.s32.totalorder %s772_s16, %s1235_s10  ;;  %p1241_p0 = scmp.lt.s32.totalorder %s1235_s10, %s1235_s10 }
 0x2e5   :  { %v507_v57 = vrot.slane %v506_v56, 1 }
 0x2e6   :  { %p1242_p1 = por %p1241_p0, %p1240_p13 }
 0x2e7   :  { %v508_v58 = vadd.f32 %v507_v57, %v506_v56 }
 0x2e8   :  { %p1243_p2 = pnand %p1242_p1, %p1236_p12 }
 0x2e9   :  { %v509_v59 = vmul.f32 0.0625, %v508_v58 }
 0x2eb   :  { %v511_v60 = vadd.f32 1e-05, %v509_v59  ;;  %v785_v59 = vld [vmem:[%s1496_s11] ss:$0 sm:$0xff] }
 0x2ed   :  { %1115 = vrsqrt.f32 %v511_v60 }
 0x2f7   :  { %v1116_v62 = vpop.eup %1115 }
 0x2f8   :  { %v513_v63 = vmul.f32 %v1116_v62, %v510_v61 }
 0x2fa   :  { %v518_v0 = vrot.slane %v513_v63, %v1443_v40  ;;  %v786_v63 = vld [vmem:[%s1498_s13] ss:$0 sm:$0xff] }
 0x2fc   :  { %v520_v2 = vmul.f32 %v518_v0, %v498_v48  ;;  %v521_v3 = vmul.f32 %v518_v0, %v499_v49 }
 0x2fe   :  { %v529_v4 = vadd.f32 %v784_v1, %v520_v2  ;;  %v530_v5 = vadd.f32 %v784_v1, %v521_v3 }
 0x300   :  { %1117 = vtanh.f32 %v529_v4 }
 0x301   :  { %1119 = vtanh.f32 %v530_v5 }
 0x30a   :  { %v1118_v6 = vpop.eup %1117 }
 0x30b   :  { %v1120_v7 = vpop.eup %1119 }
 0x30c   :  { %629 = vmatprep.mubr.f32.mxu0 %v1120_v7 }
 0x30d   :  { %630 = vmatmul.mubr.f32.vlgmr.msra.gmra.mrb[8].mxu0 %v1118_v6 }
 0x3e0   :  { %v901_v34 = vpop.f32.mrb[8].mxu0 }
 0x3e1   :  { %v902_v35 = vpop.f32.mrb[9].mxu0 }
 0x3e2   :  { %v903_v36 = vadd.f32 %v902_v35, %v901_v34 }
 0x3e4   :  { %v635_v37 = vrot.slane %v903_v36, 4 }
 0x3e6   :  { %v636_v38 = vadd.f32 %v903_v36, %v635_v37 }
 0x3e8   :  { %v637_v39 = vrot.slane %v636_v38, 2 }
 0x3ea   :  { %v638_v41 = vadd.f32 %v637_v39, %v636_v38 }
 0x3ec   :  { %v639_v42 = vrot.slane %v638_v41, 1 }
 0x3ee   :  { %v640_v43 = vadd.f32 %v639_v42, %v638_v41 }
 0x3f0   :  { %v641_v44 = vmul.f32 0.125, %v640_v43 }
 0x3f2   :  { %v642_v45 = vsub.f32 %v903_v36, %v641_v44 }
 0x3f4   :  { %v643_v46 = vmul.f32 %v642_v45, %v642_v45 }
 0x3f6   :  { %v644_v47 = vrot.slane %v643_v46, 4 }
 0x3f8   :  { %v645_v48 = vadd.f32 %v644_v47, %v643_v46 }
 0x3fa   :  { %v646_v49 = vrot.slane %v645_v48, 2 }
 0x3fc   :  { %v647_v50 = vadd.f32 %v646_v49, %v645_v48 }
 0x3fe   :  { %v648_v51 = vrot.slane %v647_v50, 1 }
 0x400   :  { %v649_v52 = vadd.f32 %v648_v51, %v647_v50 }
 0x402   :  { %v650_v53 = vmul.f32 0.125, %v649_v52 }
 0x404   :  { %v652_v54 = vadd.f32 1e-05, %v650_v53 }
 0x406   :  { %1121 = vrsqrt.f32 %v652_v54 }
 0x410   :  { %v1122_v56 = vpop.eup %1121 }
 0x411   :  { %v654_v57 = vmul.f32 %v1122_v56, %v651_v55 }
 0x413   :  { %v659_v58 = vrot.slane %v654_v57, %v1443_v40 }
 0x415   :  { %v661_v60 = vmul.f32 %v659_v58, %v642_v45 }
 0x417   :  { %v669_v61 = vadd.f32 %v785_v59, %v661_v60 }
 0x419   :  { %1123 = vtanh.f32 %v669_v61 }
 0x423   :  { %v1124_v62 = vpop.eup %1123 }
 0x424   :  { %954 = vmatmul.mubr.f32.vlgmr.msra.gmra.mrb[4].mxu1 %v1124_v62 }
 0x4f7   :  { %v760_v0 = vpop.f32.mrb[4].mxu1 }
 0x4f8   :  { %v761_v1 = vadd.f32 %v786_v63, %v760_v0  ;;  %v955_v2 = vpop.f32.mrb[5].mxu1 }
 0x4fa   :  { %764 = vst [vmem:[#allocation11] sm:$0xff] %v761_v1 }
 0x4fb   :  { %1246 = shalt.err (!%p1243_p2)
}
 0x4fc   :  { %s1247_s3 = scalar_lea.hbm %s1499_s14, 128 }
 0x4fd   :  { %p1248_p3 = scmp.ne.s32.totalorder %s1499_s14, %s1247_s3  ;;  %p1251_p4 = scmp.lt.u32.totalorder %s1247_s3, %s1499_s14 }
 0x4ff   :  { %p1253_p5 = pnand %p1251_p4, %p1248_p3 }
 0x501   :  { %1256 = shalt.err (!%p1253_p5)
}
 0x502   :  { %774 = dma.vmem_to_hbm [thread:$0]  %s772_s16, 128, %s1499_s14, [#allocation4]  }
 0x503   :  { %1263 = dma.done.wait [#allocation4], 128  }
 0x504   :  { %1264 = vsyncadd [#allocation4], 4294967168 }
 0x505   :  { %778 = vsyncpa [#allocation3], 1 }
 0x506   :  { %779 = vsyncpa [#allocation6], 1 }
 0x507   :  { %780 = vsyncpa [#allocation9], 1 }
 0x508   :  { %781 = vsyncpa [#allocation4], 1 }

</bundles_post_ra>
